<compile_context>
chip_gen: v7x
topology: tpu7x:2x2x1
jax: 0.10.0
libtpu: 0.0.40
codegen_flags: <defaults>
</compile_context>

<pallas_src>
import math

import jax
import jax.numpy as jnp
import numpy as np
from jax.experimental import pallas as pl
from jax.experimental.pallas import tpu as pltpu


def _vmem_capacity_bytes():
    """Physical VMEM per TensorCore; conservative fallback if the query fails."""
    try:
        cap = int(pltpu.get_tpu_info().vmem_capacity_bytes)
        if cap > 0:
            return cap
    except Exception:
        pass
    return 64 * 1024 * 1024  # v7x per-TC VMEM; safe lower bound for v5e/v6e.


def _round_up(v, m):
    return -(-v // m) * m


def _make_kernel(trp, W, Wo, L, L_out, G, pad_left, pad_right, stride, dtype):
    """Kernel over a (trp, W=G*L) packed row tile -> (trp, Wo=G*L_out) tile."""
    use_mask = G > 1        # internal segment boundaries need neutralizing
    use_sel = stride > 1    # in-kernel decimation via selection matmul

    def kernel(*refs):
        i = 0
        x_ref = refs[i]; i += 1
        pos_ref = refs[i] if use_mask else None
        if use_mask:
            i += 1
        sel_ref = refs[i] if use_sel else None
        if use_sel:
            i += 1
        o_ref = refs[i]

        x = x_ref[...]                                   # (trp, W)
        m = x
        if use_mask:
            # Within-segment column index; broadcast once (hoisted out of loops).
            pos = jnp.broadcast_to(pos_ref[...], (trp, W))

        def zero(n):
            return jnp.zeros((trp, n), dtype)

        # Right-looking contributions x[:, c+o].  Columns whose window crosses
        # the segment end legally contain a ConstantPad1d zero, so zero-fill
        # (tile edge via concat, internal boundaries via the mask) is exact.
        for o in range(1, min(pad_right, L - 1) + 1):
            sh = jnp.concatenate([x[:, o:], zero(o)], axis=1)
            if use_mask:
                sh = jnp.where(pos < (L - o), sh, jnp.zeros_like(sh))
            m = jnp.maximum(m, sh)

        # Left-looking contributions x[:, c-o].
        for o in range(1, min(pad_left, L - 1) + 1):
            sh = jnp.concatenate([zero(o), x[:, :W - o]], axis=1)
            if use_mask:
                sh = jnp.where(pos >= o, sh, jnp.zeros_like(sh))
            m = jnp.maximum(m, sh)

        # Shifts reaching >= L past an edge only ever contribute pad zeros.
        if pad_left >= L or pad_right >= L:
            m = jnp.maximum(m, jnp.zeros_like(m))

        if use_sel:
            # out[:, q] = m[:, (q//L_out)*L + (q%L_out)*stride] as a 0/1
            # selection matmul on the otherwise-idle MXU (exact for finite
            # floats; integers are exact up to 2^24 which is fine for
            # activation pooling).
            out = jnp.dot(m.astype(jnp.float32), sel_ref[...],
                          preferred_element_type=jnp.float32)
            o_ref[...] = out.astype(o_ref.dtype)
        else:
            o_ref[...] = m.astype(o_ref.dtype)

    return kernel


def sampadding_maxpool1d(x, pooling_size, stride):
    """Pallas implementation of SampaddingMaxPool1D.forward.  x: (N, C, L)."""
    N, C, L = x.shape
    K = int(pooling_size)
    s = int(stride)
    pad_left = (K - 1) // 2
    pad_right = K // 2
    L_out = (L + pad_left + pad_right - K) // s + 1        # == (L-1)//s + 1

    R = N * C
    itemsize = jnp.dtype(x.dtype).itemsize

    # Lane-packing factor G: pack G rows per lane-row (free reshape).
    if L >= 128:
        G = 1
    elif s == 1:
        G = 128 // math.gcd(L, 128)      # in/out widths exact multiples of 128
    else:
        G = max(1, 128 // L)             # dense-ish, keeps decimation matmul small
    W = G * L
    Wo = G * L_out

    # Generation-aware VMEM budget + explicit scoped-VMEM limit.
    cap = _vmem_capacity_bytes()
    vmem_limit = min(int(cap * 0.70), 100 * 1024 * 1024)
    tile_budget = int(vmem_limit * 0.55)

    aux_bytes = (W * 4 if G > 1 else 0) + (2 * W * Wo * 4 if s > 1 else 0)
    per_row = 2 * (W + Wo) * itemsize + 6 * W * 4   # dbl-buffered blocks + temps
    avail = max(tile_budget - aux_bytes, 8 * per_row)
    trp_budget = max(8, min(8192, avail // per_row))
    trp_budget = (trp_budget // 8) * 8

    rp = -(-R // G)                       # packed rows holding real data
    if rp > 8:
        # At least two grid steps so both v7x TensorCores get work.
        grid_target = max(2, -(-rp // trp_budget))
        trp = min(trp_budget, _round_up(-(-rp // grid_target), 8))
    else:
        trp = 8
    grid = -(-rp // trp)
    rp_total = grid * trp
    R_total = rp_total * G

    x2 = x.reshape(R, L)
    if R_total != R:
        x2 = jnp.pad(x2, ((0, R_total - R), (0, 0)))
    xp = x2.reshape(rp_total, W)

    operands = [xp]
    in_specs = [pl.BlockSpec((trp, W), lambda i: (i, 0))]
    if G > 1:
        pos = (np.arange(W, dtype=np.int32) % L).reshape(1, W)
        operands.append(jnp.asarray(pos))
        in_specs.append(pl.BlockSpec((1, W), lambda i: (0, 0)))
    if s > 1:
        q = np.arange(Wo)
        src = (q // L_out) * L + (q % L_out) * s
        sel = np.zeros((W, Wo), dtype=np.float32)
        sel[src, q] = 1.0
        operands.append(jnp.asarray(sel))
        in_specs.append(pl.BlockSpec((W, Wo), lambda i: (0, 0)))

    kernel = _make_kernel(trp, W, Wo, L, L_out, G, pad_left, pad_right, s,
                          x.dtype)

    out_packed = pl.pallas_call(
        kernel,
        out_shape=jax.ShapeDtypeStruct((rp_total, Wo), x.dtype),
        grid=(grid,),
        in_specs=in_specs,
        out_specs=pl.BlockSpec((trp, Wo), lambda i: (i, 0)),
        compiler_params=pltpu.CompilerParams(
            dimension_semantics=("parallel",),
            vmem_limit_bytes=vmem_limit),
    )(*operands)

    out2 = out_packed.reshape(R_total, L_out)
    if R_total != R:
        out2 = out2[:R]
    return out2.reshape(N, C, L_out)


def _reference_maxpool1d(x, pooling_size, stride):
    """Pure-JAX reference matching the PyTorch module exactly."""
    pad_left = (pooling_size - 1) // 2
    pad_right = pooling_size // 2
    xp = jnp.pad(x, ((0, 0), (0, 0), (pad_left, pad_right)))
    L_pad = xp.shape[-1]
    L_out = (L_pad - pooling_size) // stride + 1
    windows = jnp.stack(
        [xp[..., j * stride: j * stride + pooling_size] for j in range(L_out)],
        axis=-2,
    )  # (N, C, L_out, K)
    return windows.max(axis=-1)


if __name__ == "__main__":
    key = jax.random.PRNGKey(0)

    # Module hyper-parameters (from __init__): pooling_size, stride.
    # No learnable parameters in this module.
    configs = [
        ((2, 4, 16), 3, 2),    # original toy config (packed lanes + decimation)
        ((2, 4, 16), 3, 1),    # stride-1 (common InceptionTime path), 128-dense
        ((2, 4, 16), 2, 2),    # even kernel -> asymmetric same-padding
        ((2, 16, 40), 5, 3),   # non-power-of-two L, larger window, stride 3
        ((2, 16, 40), 5, 1),   # stride-1 full-density packing (G=16)
        ((2, 4, 160), 3, 2),   # L >= 128 -> unpacked (G=1) path
    ]

    for idx, (shape, pooling_size, stride) in enumerate(configs):
        k = jax.random.fold_in(key, idx)
        x = jax.random.normal(k, shape, dtype=jnp.float32)  # (N, C, L)

        out = sampadding_maxpool1d(x, pooling_size, stride)
        out = jax.block_until_ready(out)

        ref = _reference_maxpool1d(x, pooling_size, stride)
        assert out.shape == ref.shape, (shape, pooling_size, stride,
                                        out.shape, ref.shape)
        assert jnp.allclose(out, ref), (shape, pooling_size, stride)

    print("KERNEL_OK")
</pallas_src>

<mosaic_0001>
module attributes {stable_mosaic.version = 11 : i64} {
  func.func @kernel(%arg0: i32, %arg1: memref<8x128xf32, #tpu.memory_space<vmem>>, %arg2: memref<1x128xi32, #tpu.memory_space<vmem>>, %arg3: memref<128x64xf32, #tpu.memory_space<vmem>>, %arg4: memref<8x64xf32, #tpu.memory_space<vmem>>) attributes {dimension_semantics = [#tpu.dimension_semantics<parallel>], iteration_bounds = array<i64: 1>, scalar_prefetch = 0 : i64, scratch_operands = 0 : i64, tpu.core_type = #tpu.core_type<tc>, window_params = [{transform_indices = @transform_0, window_bounds = array<i64: 8, 128>}, {pipeline_mode = #tpu.pipeline_mode<synchronous>, transform_indices = @transform_1, window_bounds = array<i64: 1, 128>}, {pipeline_mode = #tpu.pipeline_mode<synchronous>, transform_indices = @transform_2, window_bounds = array<i64: 128, 64>}, {transform_indices = @transform_3, window_bounds = array<i64: 8, 64>}]} {
    %c0 = arith.constant 0 : index
    %c0_0 = arith.constant 0 : index
    %0 = vector.load %arg1[%c0, %c0_0] : memref<8x128xf32, #tpu.memory_space<vmem>>, vector<8x128xf32>
    %c0_1 = arith.constant 0 : index
    %c0_2 = arith.constant 0 : index
    %1 = vector.load %arg2[%c0_1, %c0_2] : memref<1x128xi32, #tpu.memory_space<vmem>>, vector<1x128xi32>
    %2 = vector.shape_cast %1 : vector<1x128xi32> to vector<1x128xi32>
    %3 = vector.broadcast %2 : vector<1x128xi32> to vector<8x128xi32>
    %4 = vector.extract_strided_slice %0 {offsets = [0, 1], sizes = [8, 127], strides = [1, 1]} : vector<8x128xf32> to vector<8x127xf32>
    %cst = arith.constant 0.000000e+00 : f32
    %5 = vector.broadcast %cst : f32 to vector<8x1xf32>
    %6 = tpu.concatenate %4, %5 in 1 : vector<8x127xf32>, vector<8x1xf32> -> vector<8x128xf32>
    %c15_i32 = arith.constant 15 : i32
    %7 = vector.broadcast %c15_i32 : i32 to vector<8x128xi32>
    %8 = arith.cmpi slt, %3, %7 : vector<8x128xi32>
    %cst_3 = arith.constant 0.000000e+00 : f32
    %9 = vector.broadcast %cst_3 : f32 to vector<8x128xf32>
    %10 = arith.select %8, %6, %9 : vector<8x128xi1>, vector<8x128xf32>
    %11 = arith.maximumf %0, %10 : vector<8x128xf32>
    %cst_4 = arith.constant 0.000000e+00 : f32
    %12 = vector.broadcast %cst_4 : f32 to vector<8x1xf32>
    %13 = vector.extract_strided_slice %0 {offsets = [0, 0], sizes = [8, 127], strides = [1, 1]} : vector<8x128xf32> to vector<8x127xf32>
    %14 = tpu.concatenate %12, %13 in 1 : vector<8x1xf32>, vector<8x127xf32> -> vector<8x128xf32>
    %c1_i32 = arith.constant 1 : i32
    %15 = vector.broadcast %c1_i32 : i32 to vector<8x128xi32>
    %16 = arith.cmpi sge, %3, %15 : vector<8x128xi32>
    %cst_5 = arith.constant 0.000000e+00 : f32
    %17 = vector.broadcast %cst_5 : f32 to vector<8x128xf32>
    %18 = arith.select %16, %14, %17 : vector<8x128xi1>, vector<8x128xf32>
    %19 = arith.maximumf %11, %18 : vector<8x128xf32>
    %c0_6 = arith.constant 0 : index
    %c0_7 = arith.constant 0 : index
    %20 = vector.load %arg3[%c0_6, %c0_7] : memref<128x64xf32, #tpu.memory_space<vmem>>, vector<128x64xf32>
    %cst_8 = arith.constant dense<0.000000e+00> : vector<8x64xf32>
    %21 = tpu.matmul %19, %20, %cst_8 {dimension_numbers = #tpu.dot_dimension_numbers<[1], [0], [0], [1], [0, 0, 1, 1], [], []>} : vector<8x128xf32>, vector<128x64xf32>, vector<8x64xf32> -> vector<8x64xf32>
    %c0_9 = arith.constant 0 : index
    %c0_10 = arith.constant 0 : index
    %22 = vector.load %arg4[%c0_9, %c0_10] : memref<8x64xf32, #tpu.memory_space<vmem>>, vector<8x64xf32>
    tpu.vector_store %arg4[%c0_9, %c0_10], %21 {strides = array<i32>} : memref<8x64xf32, #tpu.memory_space<vmem>>, vector<8x64xf32>,
    return
  }
  func.func @transform_0(%arg0: i32) -> (i32, i32) {
    %c0_i32 = arith.constant 0 : i32
    %c0_i32_0 = arith.constant 0 : i32
    return %arg0, %c0_i32 : i32, i32
  }
  func.func @transform_1(%arg0: i32) -> (i32, i32) {
    %c0_i32 = arith.constant 0 : i32
    %c0_i32_0 = arith.constant 0 : i32
    %c0_i32_1 = arith.constant 0 : i32
    return %c0_i32, %c0_i32_0 : i32, i32
  }
  func.func @transform_2(%arg0: i32) -> (i32, i32) {
    %c0_i32 = arith.constant 0 : i32
    %c0_i32_0 = arith.constant 0 : i32
    %c0_i32_1 = arith.constant 0 : i32
    return %c0_i32, %c0_i32_0 : i32, i32
  }
  func.func @transform_3(%arg0: i32) -> (i32, i32) {
    %c0_i32 = arith.constant 0 : i32
    %c0_i32_0 = arith.constant 0 : i32
    return %arg0, %c0_i32 : i32, i32
  }
}

</mosaic_0001>

<bundles_post_ra>
// kernel: tpu_custom_call.1
= control target key start
LH: loop header
LB: loop body
LE: loop exit
PB: predicated region body
PF: predicated region fallthrough
CT: control target
= control target key end

     0   :  { %s247_s18 = smov 127   ;;  %v248_v3 = vmov 0.0|0.0   ;;  %vm249_vm0 = vmmov 0   ;;  %v250_v8 = vmov 0.0   ;;  %s251_s26 = smov 1   ;;  %s344_s0 = inlined_call_operand.vmem [shape: f32[8,128], index: 0, kind: input, shape index: {}]   ;;  %s345_s1 = inlined_call_operand.vmem [shape: s32[1,128], index: 1, kind: input, shape index: {}]   ;;  %s346_s2 = inlined_call_operand.vmem [shape: f32[128,64], index: 2, kind: input, shape index: {}]   ;;  %s347_s3 = inlined_call_operand.hbm [shape: f32[8,64], index: 3, kind: output, shape index: {}]  }
   0x1   :  { %v276_v0 = vld [vmem:[%s344_s0] sm:$0xff]  ;;  %v39_v2 = vld [vmem:[%s346_s2 + $0x8] sm:$0xff]  ;;  %193 = vmatprep.subr.bf16.mxu0 %v248_v3  ;;  %v40_v5 = vld [vmem:[%s346_s2 + $0x10] sm:$0xff]  ;;  %190 = vmatprep.mubr.msk.f32.mxu0 %vm249_vm0, %v250_v8 }
   0x2   :  { %v38_v1 = vld [vmem:[%s346_s2] sm:$0xff]  ;;  %22 = vrot.lane.b32.xlu0 %v276_v0, %s247_s18  ;;  %v41_v6 = vld [vmem:[%s346_s2 + $0x18] sm:$0xff]  ;;  %v43_v10 = vld [vmem:[%s346_s2 + $0x28] sm:$0xff] }
   0x3   :  { %v194_v4 = vpack.c.bf16 %v39_v2, %v38_v1  ;;  %v197_v7 = vpack.c.bf16 %v41_v6, %v40_v5  ;;  %v42_v9 = vld [vmem:[%s346_s2 + $0x20] sm:$0xff] }
   0x5   :  { %195 = vmatpush3.bf16.msra.mxu0 %v194_v4 }
   0x6   :  { %196 = vmatprep.subr.bf16.mxu0 %v248_v3  ;;  %30 = vrot.lane.b32.xlu0 %v276_v0, %s251_s26 }
   0x7   :  { %8 = vsyncpa [#allocation3], 0  ;;  %v200_v11 = vpack.c.bf16 %v43_v10, %v42_v9  ;;  %v44_v12 = vld [vmem:[%s346_s2 + $0x30] sm:$0xff]  ;;  %v45_v13 = vld [vmem:[%s346_s2 + $0x38] sm:$0xff]  ;;  %vm25_vm1 = vcmask 1039360   ;;  %vm33_vm3 = vcmask 7168  }
   0x8   :  { %v203_v14 = vpack.c.bf16 %v45_v13, %v44_v12  ;;  %v46_v15 = vld [vmem:[%s346_s2 + $0x40] sm:$0xff]  ;;  %v47_v16 = vld [vmem:[%s346_s2 + $0x48] sm:$0xff]  ;;  %v48_v18 = vld [vmem:[%s346_s2 + $0x50] sm:$0xff]  ;;  %vm124_vm5 = vcmask 523264  }
   0x9   :  { %198 = vmatpush3.bf16.msra.mxu0 %v197_v7  ;;  %v206_v17 = vpack.c.bf16 %v47_v16, %v46_v15  ;;  %v49_v19 = vld [vmem:[%s346_s2 + $0x58] sm:$0xff]  ;;  %v50_v21 = vld [vmem:[%s346_s2 + $0x60] sm:$0xff]  ;;  %v51_v22 = vld [vmem:[%s346_s2 + $0x68] sm:$0xff] }
   0xa   :  { %199 = vmatprep.subr.bf16.mxu0 %v248_v3  ;;  %v209_v20 = vpack.c.bf16 %v49_v19, %v48_v18  ;;  %v212_v23 = vpack.c.bf16 %v51_v22, %v50_v21  ;;  %v52_v24 = vld [vmem:[%s346_s2 + $0x70] sm:$0xff]  ;;  %v53_v25 = vld [vmem:[%s346_s2 + $0x78] sm:$0xff]  ;;  %v140_v27 = vld [vmem:[%s345_s1] ss:$0 sm:$0xff]  ;;  %s252_s2 = smov [#allocation2]  }
   0xb   :  { %v215_v26 = vpack.c.bf16 %v53_v25, %v52_v24  ;;  %vm27_vm2 = vcmp.lt.s32.totalorder %v140_v27, 15  ;;  %vm35_vm4 = vcmp.ge.s32.totalorder %v140_v27, 1  ;;  %s132_s21 = sshll.u32 %s252_s2, 4  ;;  %s133_s21 = int_to_ptr.vmem [resolvable:$true] %s132_s21 }
   0xc   :  { %s223_s1 = scalar_lea.vmem %s133_s21, 128  ;;  %p228_p1 = scmp.lt.s32.totalorder %s133_s21, %s133_s21 }
   0xd   :  { %201 = vmatpush3.bf16.msra.mxu0 %v200_v11  ;;  %p224_p0 = scmp.ne.s32.totalorder %s133_s21, %s223_s1  ;;  %p229_p2 = scmp.lt.s32.totalorder %s223_s1, %s223_s1 }
   0xe   :  { %202 = vmatprep.subr.bf16.mxu0 %v248_v3 }
   0xf   :  { %p230_p3 = por %p229_p2, %p228_p1 }
  0x11   :  { %204 = vmatpush3.bf16.msra.mxu0 %v203_v14  ;;  %p231_p4 = pnand %p230_p3, %p224_p0 }
  0x12   :  { %205 = vmatprep.subr.bf16.mxu0 %v248_v3 }
  0x15   :  { %207 = vmatpush3.bf16.msra.mxu0 %v206_v17 }
  0x16   :  { %208 = vmatprep.subr.bf16.mxu0 %v248_v3 }
  0x19   :  { %210 = vmatpush3.bf16.msra.mxu0 %v209_v20 }
  0x1a   :  { %211 = vmatprep.subr.bf16.mxu0 %v248_v3 }
  0x1d   :  { %213 = vmatpush3.bf16.msra.mxu0 %v212_v23 }
  0x1e   :  { %214 = vmatprep.subr.bf16.mxu0 %v248_v3 }
  0x21   :  { %216 = vmatpush3.bf16.msra.mxu0 %v215_v26 }
  0x74   :  { %v23_v28 = vpop.permute.xlu0 %22 }
  0x75   :  { %v26_v29 = vsel %vm25_vm1, %v23_v28, 0.0 }
  0x76   :  { %v28_v30 = vsel %vm27_vm2, %v26_v29, 0.0 }
  0x77   :  { %v29_v32 = vmax.f32 %v276_v0, %v28_v30 }
  0x78   :  { %v31_v31 = vpop.permute.xlu0 %30 }
  0x79   :  { %v34_v33 = vsel %vm33_vm3, 0.0, %v31_v31 }
  0x7a   :  { %v36_v34 = vsel %vm35_vm4, %v34_v33, 0.0 }
  0x7b   :  { %v37_v35 = vmax.f32 %v29_v32, %v36_v34 }
  0x7d   :  { %191 = vmatmul.mubr.f32.vlgmr.msra.gmra.mrb[0].mxu0 %v37_v35 }
 0x150   :  { %v120_v36 = vpop.f32.mrb[0].mxu0 }
 0x151   :  { %125 = vst.msk [vmem:[#allocation2] sm:$0xff] %vm124_vm5, %v120_v36  ;;  %v192_v37 = vpop.f32.mrb[1].mxu0 }
 0x152   :  { %234 = shalt.err (!%p231_p4)
}
 0x153   :  { %s235_s24 = scalar_lea.hbm %s347_s3, 128 }
 0x154   :  { %p236_p5 = scmp.ne.s32.totalorder %s347_s3, %s235_s24  ;;  %p239_p6 = scmp.lt.u32.totalorder %s235_s24, %s347_s3 }
 0x156   :  { %p241_p7 = pnand %p239_p6, %p236_p5 }
 0x158   :  { %244 = shalt.err (!%p241_p7)
}
 0x159   :  { %135 = dma.vmem_to_hbm [thread:$0]  %s133_s21, 128, %s347_s3, [#allocation3]  }
 0x15a   :  { %245 = dma.done.wait [#allocation3], 128  }
 0x15b   :  { %246 = vsyncadd [#allocation3], 4294967168 }
 0x15c   :  { %139 = vsyncpa [#allocation3], 1 }

</bundles_post_ra>
